<compile_context>
chip_gen: v7x
topology: tpu7x:2x2x1
jax: 0.10.0
libtpu: 0.0.40
codegen_flags: <defaults>
</compile_context>

<pallas_src>
import math

import jax
import jax.numpy as jnp
from jax.experimental import pallas as pl
from jax.experimental.pallas import tpu as pltpu

_INV_SQRT2 = 1.0 / math.sqrt(2.0)

# ~512K elements per block: 2 MiB (f32) / 1 MiB (bf16) per buffer; with
# double-buffered input + output that is <= 8 MiB of pipelined VMEM.
_TARGET_BLOCK_ELEMS = 512 * 1024


def _gelu_kernel_exact(x_ref, o_ref):
    """Exact-erf GELU (f32 math internally)."""
    xf = x_ref[...].astype(jnp.float32)
    o_ref[...] = (xf * 0.5 * (1.0 + jax.lax.erf(xf * _INV_SQRT2))).astype(o_ref.dtype)


def _gelu_kernel_eup(x_ref, o_ref):
    """GELU with an EUP-routed erf (A&S 7.1.26, |err| <= 1.5e-7).

    Moves the transcendental work to exp/reciprocal (EUP slot), leaving only
    ~10 VALU mul/adds per element.  Used for sub-f32 inputs where the
    approximation error is far below the output dtype's resolution.
    """
    xf = x_ref[...].astype(jnp.float32)
    z = xf * _INV_SQRT2
    az = jnp.abs(z)
    t = 1.0 / (1.0 + 0.3275911 * az)
    poly = ((((1.061405429 * t - 1.453152027) * t + 1.421413741) * t
             - 0.284496736) * t + 0.254829592) * t
    erf_abs = 1.0 - poly * jnp.exp(-az * az)
    erf_z = jnp.sign(z) * erf_abs
    o_ref[...] = (xf * 0.5 * (1.0 + erf_z)).astype(o_ref.dtype)


def _is_multi_core_chip():
    try:
        return "v7" in jax.devices()[0].device_kind.lower()
    except Exception:
        return False


def gelu(x, *, use_eup_erf=None):
    """Elementwise exact-semantics GELU; any shape/dtype, same shape/dtype out."""
    orig_shape = x.shape
    dtype = x.dtype
    n = x.size
    if n == 0:
        return x
    itemsize = dtype.itemsize

    if use_eup_erf is None:
        # f32 keeps exact lax.erf; bf16/f16 get the EUP-routed erf (its 1.5e-7
        # absolute error is invisible at those output precisions).
        use_eup_erf = itemsize < 4
    kernel = _gelu_kernel_eup if use_eup_erf else _gelu_kernel_exact

    # ---- pick a lane-dense 2-D view without copying (reshape only) ----------
    last = orig_shape[-1] if x.ndim >= 1 else 1
    C = None
    if x.ndim >= 2 and last % 128 == 0 and last <= 16384:
        C = last                                   # free reshape to (-1, last)
    else:
        for cand in (1024, 512, 256, 128):
            if n >= cand and n % cand == 0:
                C = cand                           # free reshape, still no copy
                break

    pad = 0
    flat = x.reshape(-1)
    if C is None:
        if n < 128:
            C = n                                  # single tiny full-extent block
        else:
            # Truly ragged element count: pad once (rare; GELU(0)=0 so benign).
            C = 128
            pad = (-n) % C
            flat = jnp.pad(flat, (0, pad))
    rows = (n + pad) // C

    # ---- row tile: ~512K elems per block, multiple of 8 sublanes ------------
    tm = max(_TARGET_BLOCK_ELEMS // C, 1)
    tm = max((tm // 8) * 8, 8)
    if tm >= rows:
        tm = rows                                  # full extent; any row count legal
    grid = (pl.cdiv(rows, tm),)                    # partial last block is masked

    # ---- cost estimate (realistic erf cost) ----------------------------------
    total = rows * C
    if use_eup_erf:
        flops, transcendentals = 15 * total, 2 * total   # exp + reciprocal on EUP
    else:
        flops, transcendentals = 30 * total, 0           # erf is a VALU polynomial
    cost = pl.CostEstimate(flops=flops, transcendentals=transcendentals,
                           bytes_accessed=2 * n * itemsize)

    x2d = flat.reshape(rows, C)
    out_shape = jax.ShapeDtypeStruct((rows, C), dtype)
    in_specs = [pl.BlockSpec((tm, C), lambda i: (i, 0))]
    out_specs = pl.BlockSpec((tm, C), lambda i: (i, 0))

    # ---- dimension semantics: explicit core-split on multi-TC chips ---------
    semantics_candidates = []
    if _is_multi_core_chip() and grid[0] > 1:
        semantics_candidates.append((pltpu.CORE_PARALLEL,))
    semantics_candidates.append(("parallel",))

    out = None
    err = None
    for sem in semantics_candidates:
        try:
            out = pl.pallas_call(
                kernel,
                out_shape=out_shape,
                grid=grid,
                in_specs=in_specs,
                out_specs=out_specs,
                compiler_params=pltpu.CompilerParams(dimension_semantics=sem),
                cost_estimate=cost,
            )(x2d)
            break
        except Exception as e:  # fall back to plain "parallel" if rejected
            err = e
            out = None
    if out is None:
        raise err

    out_flat = out.reshape(-1)
    if pad:
        out_flat = out_flat[:n]
    return out_flat.reshape(orig_shape)


def _reference_gelu(x):
    xf = x.astype(jnp.float32)
    return (xf * 0.5 * (1.0 + jax.lax.erf(xf / math.sqrt(2.0)))).astype(x.dtype)


if __name__ == "__main__":
    key = jax.random.PRNGKey(0)
    k1, k2, k3, k4 = jax.random.split(key, 4)

    # 1) Small shape consistent with the module's usage (batch=2, seq=8, hidden=32).
    x_small = jax.random.normal(k1, (2, 8, 32), jnp.float32)
    y_small = jax.block_until_ready(gelu(x_small))
    ref_small = _reference_gelu(x_small)
    assert y_small.shape == x_small.shape and y_small.dtype == x_small.dtype
    assert jnp.allclose(y_small, ref_small, atol=1e-6, rtol=1e-6), "f32 small mismatch"

    # 2) f32, multi-step grid with a partial last row-block (rows=1200, tm=1024).
    x_mid = jax.random.normal(k2, (3, 400, 512), jnp.float32)
    y_mid = jax.block_until_ready(gelu(x_mid))
    ref_mid = _reference_gelu(x_mid)
    assert y_mid.shape == x_mid.shape and y_mid.dtype == x_mid.dtype
    assert jnp.allclose(y_mid, ref_mid, atol=1e-6, rtol=1e-6), "f32 mid mismatch"

    # 3) bf16, lane-dense, multi-step grid, EUP-routed erf path.
    x_big = jax.random.normal(k3, (4, 1024, 512), jnp.float32).astype(jnp.bfloat16)
    y_big = jax.block_until_ready(gelu(x_big))
    ref_big = _reference_gelu(x_big)
    assert y_big.shape == x_big.shape and y_big.dtype == x_big.dtype
    assert jnp.allclose(y_big.astype(jnp.float32), ref_big.astype(jnp.float32),
                        atol=2e-2, rtol=2e-2), "bf16 mismatch"

    # 4) Ragged element count exercises the (rare) pad fallback.
    x_rag = jax.random.normal(k4, (5, 7, 9), jnp.float32)
    y_rag = jax.block_until_ready(gelu(x_rag))
    ref_rag = _reference_gelu(x_rag)
    assert y_rag.shape == x_rag.shape and y_rag.dtype == x_rag.dtype
    assert jnp.allclose(y_rag, ref_rag, atol=1e-6, rtol=1e-6), "ragged mismatch"

    print("KERNEL_OK")
</pallas_src>

<mosaic_0001>
module attributes {stable_mosaic.version = 11 : i64} {
  func.func @_gelu_kernel_exact(%arg0: i32, %arg1: memref<1x512xf32, #tpu.memory_space<vmem>>, %arg2: memref<1x512xf32, #tpu.memory_space<vmem>>) attributes {dimension_semantics = [#tpu.dimension_semantics<parallel>], iteration_bounds = array<i64: 1>, scalar_prefetch = 0 : i64, scratch_operands = 0 : i64, tpu.core_type = #tpu.core_type<tc>, window_params = [{transform_indices = @transform_0, window_bounds = array<i64: 1, 512>}, {transform_indices = @transform_1, window_bounds = array<i64: 1, 512>}]} {
    %c0 = arith.constant 0 : index
    %c0_0 = arith.constant 0 : index
    %0 = vector.load %arg1[%c0, %c0_0] : memref<1x512xf32, #tpu.memory_space<vmem>>, vector<1x512xf32>
    %cst = arith.constant 5.000000e-01 : f32
    %1 = vector.broadcast %cst : f32 to vector<1x512xf32>
    %2 = arith.mulf %0, %1 : vector<1x512xf32>
    %cst_1 = arith.constant 0.707106769 : f32
    %3 = vector.broadcast %cst_1 : f32 to vector<1x512xf32>
    %4 = arith.mulf %0, %3 : vector<1x512xf32>
    %5 = math.erf %4 : vector<1x512xf32>
    %cst_2 = arith.constant 1.000000e+00 : f32
    %6 = vector.broadcast %cst_2 : f32 to vector<1x512xf32>
    %7 = arith.addf %6, %5 : vector<1x512xf32>
    %8 = arith.mulf %2, %7 : vector<1x512xf32>
    %c0_3 = arith.constant 0 : index
    %c0_4 = arith.constant 0 : index
    %9 = vector.load %arg2[%c0_3, %c0_4] : memref<1x512xf32, #tpu.memory_space<vmem>>, vector<1x512xf32>
    tpu.vector_store %arg2[%c0_3, %c0_4], %8 {strides = array<i32>} : memref<1x512xf32, #tpu.memory_space<vmem>>, vector<1x512xf32>,
    return
  }
  func.func @transform_0(%arg0: i32) -> (i32, i32) {
    %c0_i32 = arith.constant 0 : i32
    %c0_i32_0 = arith.constant 0 : i32
    return %arg0, %c0_i32 : i32, i32
  }
  func.func @transform_1(%arg0: i32) -> (i32, i32) {
    %c0_i32 = arith.constant 0 : i32
    %c0_i32_0 = arith.constant 0 : i32
    return %arg0, %c0_i32 : i32, i32
  }
}

</mosaic_0001>

<bundles_post_ra>
// kernel: tpu_custom_call.1
= control target key start
LH: loop header
LB: loop body
LE: loop exit
PB: predicated region body
PF: predicated region fallthrough
CT: control target
= control target key end

     0   :  { %6 = vsyncpa [#allocation3], 0  ;;  %s135_s0 = inlined_call_operand.hbm [shape: f32[1,512], index: 0, kind: input, shape index: {}]   ;;  %s136_s1 = inlined_call_operand.hbm [shape: f32[1,512], index: 1, kind: output, shape index: {}]  }
   0x1   :  { %7 = vsyncpa [#allocation4], 0  ;;  %s99_s6 = smov [#allocation2]   ;;  %s51_s10 = scalar_lea.hbm %s135_s0, 64 }
   0x2   :  { %s14_s7 = sshll.u32 %s99_s6, 4  ;;  %p52_p0 = scmp.ne.s32.totalorder %s135_s0, %s51_s10  ;;  %s15_s7 = int_to_ptr.vmem [resolvable:$true] %s14_s7 }
   0x3   :  { %p55_p1 = scmp.lt.u32.totalorder %s51_s10, %s135_s0 }
   0x5   :  { %p57_p2 = pnand %p55_p1, %p52_p0 }
   0x7   :  { %60 = shalt.err (!%p57_p2)
}
   0x8   :  { %s61_s15 = scalar_lea.vmem %s15_s7, 64  ;;  %p66_p4 = scmp.lt.s32.totalorder %s15_s7, %s15_s7 }
   0x9   :  { %p62_p3 = scmp.ne.s32.totalorder %s15_s7, %s61_s15  ;;  %p67_p5 = scmp.lt.s32.totalorder %s61_s15, %s61_s15 }
   0xb   :  { %p68_p6 = por %p67_p5, %p66_p4 }
   0xd   :  { %p69_p7 = pnand %p68_p6, %p62_p3 }
   0xf   :  { %72 = shalt.err (!%p69_p7)
}
  0x10   :  { %17 = dma.hbm_to_vmem [thread:$0]  %s135_s0, 64, %s15_s7, [#allocation3]  }
  0x11   :  { %95 = dma.done.wait [#allocation3], 64  }
  0x12   :  { %96 = vsyncadd [#allocation3], 4294967232  ;;  %v21_v0 = vld [vmem:[#allocation2] sm:$0xf]  ;;  %v27_v2 = vlaneseq  ;;  %s100_s18 = smov [#allocation5]  }
  0x13   :  { %v23_v1 = vmul.f32 0.70710677, %v21_v0  ;;  %v22_v3 = vmul.f32 0.5, %v21_v0  ;;  %s38_s19 = sshll.u32 %s100_s18, 4  ;;  %s39_s19 = int_to_ptr.vmem [resolvable:$true] %s38_s19 }
  0x14   :  { %vm29_vm0 = vcmp.lt.s32.totalorder %v27_v2, 512  ;;  %s73_s20 = scalar_lea.vmem %s39_s19, 64  ;;  %p78_p9 = scmp.lt.s32.totalorder %s39_s19, %s39_s19 }
  0x15   :  { %49 = verf.f32 %v23_v1  ;;  %p74_p8 = scmp.ne.s32.totalorder %s39_s19, %s73_s20  ;;  %p79_p10 = scmp.lt.s32.totalorder %s73_s20, %s73_s20 }
  0x17   :  { %p80_p11 = por %p79_p10, %p78_p9 }
  0x19   :  { %p81_p12 = pnand %p80_p11, %p74_p8 }
  0x1f   :  { %v50_v4 = vpop.eup %49 }
  0x20   :  { %v25_v5 = vadd.f32 1.0, %v50_v4 }
  0x22   :  { %v26_v6 = vmul.f32 %v25_v5, %v22_v3 }
  0x24   :  { %31 = vst.msk [vmem:[#allocation5] sm:$0xf] %vm29_vm0, %v26_v6 }
  0x25   :  { %84 = shalt.err (!%p81_p12)
}
  0x26   :  { %s85_s22 = scalar_lea.hbm %s136_s1, 64 }
  0x27   :  { %p86_p13 = scmp.ne.s32.totalorder %s136_s1, %s85_s22  ;;  %p89_p0 = scmp.lt.u32.totalorder %s85_s22, %s136_s1 }
  0x29   :  { %p91_p1 = pnand %p89_p0, %p86_p13 }
  0x2b   :  { %94 = shalt.err (!%p91_p1)
}
  0x2c   :  { %41 = dma.vmem_to_hbm [thread:$0]  %s39_s19, 64, %s136_s1, [#allocation4]  }
  0x2d   :  { %97 = dma.done.wait [#allocation4], 64  }
  0x2e   :  { %98 = vsyncadd [#allocation4], 4294967232 }
  0x2f   :  { %45 = vsyncpa [#allocation3], 1 }
  0x30   :  { %46 = vsyncpa [#allocation4], 1 }

</bundles_post_ra>
